<compile_context>
chip_gen: v5e
topology: v5e:2x2
jax: 0.10.0
libtpu: 0.0.40
codegen_flags: <defaults>
</compile_context>

<pallas_src>
import functools

import jax
import jax.numpy as jnp
from jax.experimental import pallas as pl
from jax.experimental.pallas import tpu as pltpu


def _indicator_kernel(x_ref, wconv_ref, bconv_ref, wfnn_ref, bfnn_ref, o_ref, xu_ref,
                      *, ksize, op_dtype):
    # x_ref    : (bb, L, in_dim)   native dtype (cast to op_dtype in-kernel, no HBM pass)
    # wconv_ref: (K, ctx)          op_dtype, (tap, in_dim)-major rows, grid-invariant
    # bconv_ref: (1, ctx)          f32
    # wfnn_ref : (ctx, ctx)        op_dtype (in x out)
    # bfnn_ref : (1, ctx)          f32
    # o_ref    : (bb, l_out, ctx)  out dtype (bf16 on the fast path)
    # xu_ref   : (bb, l_out, K)    op_dtype VMEM scratch for the im2col tile
    bb, l_out, _ = o_ref.shape
    in_dim = x_ref.shape[-1]

    wconv = wconv_ref[...]
    wfnn = wfnn_ref[...]
    bconv = bconv_ref[...]
    bfnn = bfnn_ref[...]

    for b in range(bb):                      # bb <= 8: small static unroll
        # In-kernel im2col: build (l_out, ksize*in_dim) with static slices (VMEM only,
        # zero extra HBM bytes).
        for j in range(ksize):
            xu_ref[b, :, j * in_dim:(j + 1) * in_dim] = (
                x_ref[b, j:j + l_out, :].astype(op_dtype))
        # Conv1d as one deep 2-D matmul on the MXU, f32 accumulate.
        acc = jnp.dot(xu_ref[b], wconv, preferred_element_type=jnp.float32)
        h = jnp.maximum(acc + bconv, 0.0)                      # bias + relu in f32
        y = jnp.dot(h.astype(op_dtype), wfnn,
                    preferred_element_type=jnp.float32) + bfnn
        o_ref[b] = jax.nn.sigmoid(y).astype(o_ref.dtype)       # narrow (ctx-wide) store


def _tile_bytes(shape, itemsize):
    """VMEM footprint of a 2-D block after (8, 128) tile padding of the minor dims."""
    dims = list(shape)
    dims[-1] = -(-dims[-1] // 128) * 128
    if len(dims) >= 2:
        dims[-2] = -(-dims[-2] // 8) * 8
    n = 1
    for d in dims:
        n *= d
    return n * itemsize


def _choose_batch_block(batch, per_batch_vmem_bytes, rows_per_batch, *, max_unroll=8,
                        row_target=4096, vmem_budget=20 << 20):
    """Largest divisor of `batch` (<= max_unroll) whose grouped block fits comfortably."""
    best = 1
    for d in range(1, min(batch, max_unroll) + 1):
        if batch % d:
            continue
        if d * per_batch_vmem_bytes > vmem_budget:
            break
        if d > 1 and d * rows_per_batch > row_target:
            break
        best = d
    # v7x has two TensorCores: keep >= 2 "parallel" grid steps when each step would
    # still have a healthy number of rows; otherwise a single step is cheapest.
    if batch > 1 and best == batch and (batch // 2) * rows_per_batch >= 512:
        for d in range(batch // 2, 0, -1):
            if batch % d == 0 and d <= max_unroll:
                best = d
                break
    return best


def indicator_forward(x, wconv, bconv, wfnn, bfnn, *, ksize, use_bf16=True,
                      out_dtype=None):
    """x: (B, L, in_dim). wconv: (ksize, in_dim, ctx) tap-major. wfnn: (in=ctx, out=ctx)."""
    B, L, in_dim = x.shape
    ctx = wconv.shape[-1]
    l_out = L - ksize + 1
    K = ksize * in_dim

    op_dtype = jnp.bfloat16 if use_bf16 else jnp.float32
    if out_dtype is None:
        # bf16 output halves the dominant HBM writeback on the fast path (sigmoid is in
        # [0,1], well within the accepted tolerance); the exact path keeps x's dtype.
        out_dtype = jnp.bfloat16 if use_bf16 else x.dtype
    out_dtype = jnp.dtype(out_dtype)
    op_size = jnp.dtype(op_dtype).itemsize

    # Weights / biases are tiny and grid-invariant: reshape + cast once in the wrapper.
    wconv2d = wconv.reshape(K, ctx).astype(op_dtype)
    wfnn2d = wfnn.astype(op_dtype)
    bconv2d = bconv.reshape(1, ctx).astype(jnp.float32)
    bfnn2d = bfnn.reshape(1, ctx).astype(jnp.float32)

    # Per-batch VMEM footprint (tile-padded); in/out blocks are double-buffered by the
    # pipeline, the im2col scratch is single-buffered.
    per_batch = (2 * _tile_bytes((L, in_dim), x.dtype.itemsize)
                 + 2 * _tile_bytes((l_out, ctx), out_dtype.itemsize)
                 + _tile_bytes((l_out, K), op_size))
    bb = _choose_batch_block(B, per_batch, l_out)
    n_steps = B // bb

    w_bytes = (_tile_bytes((K, ctx), op_size) + _tile_bytes((ctx, ctx), op_size)
               + 2 * _tile_bytes((1, ctx), 4))
    vmem_est = bb * per_batch + 2 * w_bytes + (1 << 20)
    vmem_limit = None if vmem_est <= (28 << 20) else int(vmem_est + (8 << 20))

    cost = pl.CostEstimate(
        flops=int(2 * B * l_out * (K * ctx + ctx * ctx)),
        transcendentals=int(B * l_out * ctx),
        bytes_accessed=int(x.size * x.dtype.itemsize
                           + B * l_out * ctx * out_dtype.itemsize
                           + (K * ctx + ctx * ctx) * op_size + 2 * ctx * 4),
    )

    kernel = functools.partial(_indicator_kernel, ksize=ksize, op_dtype=op_dtype)
    return pl.pallas_call(
        kernel,
        out_shape=jax.ShapeDtypeStruct((B, l_out, ctx), out_dtype),
        grid_spec=pltpu.PrefetchScalarGridSpec(
            num_scalar_prefetch=0,
            grid=(n_steps,),
            in_specs=[
                pl.BlockSpec((bb, L, in_dim), lambda i: (i, 0, 0)),
                pl.BlockSpec((K, ctx), lambda i: (0, 0)),      # grid-invariant weights
                pl.BlockSpec((1, ctx), lambda i: (0, 0)),
                pl.BlockSpec((ctx, ctx), lambda i: (0, 0)),
                pl.BlockSpec((1, ctx), lambda i: (0, 0)),
            ],
            out_specs=pl.BlockSpec((bb, l_out, ctx), lambda i: (i, 0, 0)),
            scratch_shapes=[pltpu.VMEM((bb, l_out, K), op_dtype)],
        ),
        compiler_params=pltpu.CompilerParams(
            dimension_semantics=("parallel",),
            vmem_limit_bytes=vmem_limit),
        cost_estimate=cost,
    )(x, wconv2d, bconv2d, wfnn2d, bfnn2d)


def indicator_reference(x, wconv, bconv, wfnn, bfnn, *, ksize):
    """Pure-JAX f32 reference of the PyTorch forward (NLC layout)."""
    B, L, in_dim = x.shape
    ctx = wconv.shape[-1]
    l_out = L - ksize + 1
    acc = jnp.zeros((B, l_out, ctx), jnp.float32)
    for j in range(ksize):
        acc = acc + jnp.einsum("bli,ic->blc",
                               x[:, j:j + l_out, :].astype(jnp.float32), wconv[j])
    h = jnp.maximum(acc + bconv, 0.0)
    y = jnp.einsum("blc,cd->bld", h, wfnn) + bfnn
    return jax.nn.sigmoid(y)


if __name__ == "__main__":
    # Small shapes consistent with the module: nlayer=1 Conv1d(in_dim, ctx_scope, ksize).
    B, L, in_dim, ctx_scope, ksize = 2, 16, 32, 32, 3

    key = jax.random.PRNGKey(0)
    kx, kw1, kb1, kw2, kb2 = jax.random.split(key, 5)

    x = jax.random.normal(kx, (B, L, in_dim), dtype=jnp.float32)

    # Conv1d weight in PyTorch is (out_ch, in_ch, ksize); store tap-major (ksize, in_ch, out_ch).
    wconv_pt = jax.random.normal(kw1, (ctx_scope, in_dim, ksize), dtype=jnp.float32) * 0.1
    wconv = jnp.transpose(wconv_pt, (2, 1, 0))
    bconv = jax.random.normal(kb1, (ctx_scope,), dtype=jnp.float32) * 0.1

    # Linear weight in PyTorch is (out, in); pass pre-transposed (in, out).
    wfnn_pt = jax.random.normal(kw2, (ctx_scope, ctx_scope), dtype=jnp.float32) * 0.1
    wfnn = wfnn_pt.T
    bfnn = jax.random.normal(kb2, (ctx_scope,), dtype=jnp.float32) * 0.1

    ref = indicator_reference(x, wconv, bconv, wfnn, bfnn, ksize=ksize)

    # Exact path (f32 operands, f32 output): tight check against the PyTorch-equivalent math.
    out_f32 = indicator_forward(x, wconv, bconv, wfnn, bfnn, ksize=ksize, use_bf16=False)
    out_f32 = jax.block_until_ready(out_f32)
    assert out_f32.shape == (B, L - ksize + 1, ctx_scope), out_f32.shape
    assert out_f32.dtype == x.dtype, out_f32.dtype
    assert jnp.allclose(out_f32, ref, atol=1e-5, rtol=1e-5), float(
        jnp.max(jnp.abs(out_f32 - ref)))

    # Fast path (bf16 MXU operands + bf16 output, f32 accumulate/epilogue): relaxed check.
    out_bf16 = indicator_forward(x, wconv, bconv, wfnn, bfnn, ksize=ksize, use_bf16=True)
    out_bf16 = jax.block_until_ready(out_bf16)
    assert out_bf16.shape == (B, L - ksize + 1, ctx_scope), out_bf16.shape
    assert jnp.allclose(out_bf16.astype(jnp.float32), ref, atol=3e-2, rtol=3e-2), float(
        jnp.max(jnp.abs(out_bf16.astype(jnp.float32) - ref)))

    print("KERNEL_OK")
</pallas_src>

<mosaic_0001>
module attributes {stable_mosaic.version = 11 : i64} {
  func.func @_indicator_kernel(%arg0: i32, %arg1: memref<2x16x32xf32, #tpu.memory_space<vmem>>, %arg2: memref<96x32xf32, #tpu.memory_space<vmem>>, %arg3: memref<1x32xf32, #tpu.memory_space<vmem>>, %arg4: memref<32x32xf32, #tpu.memory_space<vmem>>, %arg5: memref<1x32xf32, #tpu.memory_space<vmem>>, %arg6: memref<2x14x32xf32, #tpu.memory_space<vmem>>, %arg7: memref<2x14x96xf32, #tpu.memory_space<vmem>>) attributes {dimension_semantics = [#tpu.dimension_semantics<parallel>], iteration_bounds = array<i64: 1>, scalar_prefetch = 0 : i64, scratch_operands = 1 : i64, tpu.core_type = #tpu.core_type<tc>, window_params = [{transform_indices = @transform_0, window_bounds = array<i64: 2, 16, 32>}, {pipeline_mode = #tpu.pipeline_mode<synchronous>, transform_indices = @transform_1, window_bounds = array<i64: 96, 32>}, {pipeline_mode = #tpu.pipeline_mode<synchronous>, transform_indices = @transform_2, window_bounds = array<i64: 1, 32>}, {pipeline_mode = #tpu.pipeline_mode<synchronous>, transform_indices = @transform_3, window_bounds = array<i64: 32, 32>}, {pipeline_mode = #tpu.pipeline_mode<synchronous>, transform_indices = @transform_4, window_bounds = array<i64: 1, 32>}, {transform_indices = @transform_5, window_bounds = array<i64: 2, 14, 32>}]} {
    %c0 = arith.constant 0 : index
    %c0_0 = arith.constant 0 : index
    %0 = vector.load %arg2[%c0, %c0_0] : memref<96x32xf32, #tpu.memory_space<vmem>>, vector<96x32xf32>
    %c0_1 = arith.constant 0 : index
    %c0_2 = arith.constant 0 : index
    %1 = vector.load %arg4[%c0_1, %c0_2] : memref<32x32xf32, #tpu.memory_space<vmem>>, vector<32x32xf32>
    %c0_3 = arith.constant 0 : index
    %c0_4 = arith.constant 0 : index
    %2 = vector.load %arg3[%c0_3, %c0_4] : memref<1x32xf32, #tpu.memory_space<vmem>>, vector<1x32xf32>
    %c0_5 = arith.constant 0 : index
    %c0_6 = arith.constant 0 : index
    %3 = vector.load %arg5[%c0_5, %c0_6] : memref<1x32xf32, #tpu.memory_space<vmem>>, vector<1x32xf32>
    %c0_7 = arith.constant 0 : index
    %c0_8 = arith.constant 0 : index
    %c0_9 = arith.constant 0 : index
    %4 = vector.load %arg1[%c0_7, %c0_8, %c0_9] : memref<2x16x32xf32, #tpu.memory_space<vmem>>, vector<1x14x32xf32>
    %5 = vector.shape_cast %4 : vector<1x14x32xf32> to vector<14x32xf32>
    %c0_10 = arith.constant 0 : index
    %c0_11 = arith.constant 0 : index
    %c0_12 = arith.constant 0 : index
    %6 = vector.load %arg7[%c0_10, %c0_11, %c0_12] : memref<2x14x96xf32, #tpu.memory_space<vmem>>, vector<1x14x32xf32>
    %7 = vector.shape_cast %6 : vector<1x14x32xf32> to vector<14x32xf32>
    %8 = vector.shape_cast %5 : vector<14x32xf32> to vector<1x14x32xf32>
    tpu.vector_store %arg7[%c0_10, %c0_11, %c0_12], %8 {strides = array<i32>} : memref<2x14x96xf32, #tpu.memory_space<vmem>>, vector<1x14x32xf32>,
    %c0_13 = arith.constant 0 : index
    %c1 = arith.constant 1 : index
    %c0_14 = arith.constant 0 : index
    %9 = vector.load %arg1[%c0_13, %c1, %c0_14] : memref<2x16x32xf32, #tpu.memory_space<vmem>>, vector<1x14x32xf32>
    %10 = vector.shape_cast %9 : vector<1x14x32xf32> to vector<14x32xf32>
    %c0_15 = arith.constant 0 : index
    %c0_16 = arith.constant 0 : index
    %c32 = arith.constant 32 : index
    %11 = vector.load %arg7[%c0_15, %c0_16, %c32] : memref<2x14x96xf32, #tpu.memory_space<vmem>>, vector<1x14x32xf32>
    %12 = vector.shape_cast %11 : vector<1x14x32xf32> to vector<14x32xf32>
    %13 = vector.shape_cast %10 : vector<14x32xf32> to vector<1x14x32xf32>
    tpu.vector_store %arg7[%c0_15, %c0_16, %c32], %13 {strides = array<i32>} : memref<2x14x96xf32, #tpu.memory_space<vmem>>, vector<1x14x32xf32>,
    %c0_17 = arith.constant 0 : index
    %c2 = arith.constant 2 : index
    %c0_18 = arith.constant 0 : index
    %14 = vector.load %arg1[%c0_17, %c2, %c0_18] : memref<2x16x32xf32, #tpu.memory_space<vmem>>, vector<1x14x32xf32>
    %15 = vector.shape_cast %14 : vector<1x14x32xf32> to vector<14x32xf32>
    %c0_19 = arith.constant 0 : index
    %c0_20 = arith.constant 0 : index
    %c64 = arith.constant 64 : index
    %16 = vector.load %arg7[%c0_19, %c0_20, %c64] : memref<2x14x96xf32, #tpu.memory_space<vmem>>, vector<1x14x32xf32>
    %17 = vector.shape_cast %16 : vector<1x14x32xf32> to vector<14x32xf32>
    %18 = vector.shape_cast %15 : vector<14x32xf32> to vector<1x14x32xf32>
    tpu.vector_store %arg7[%c0_19, %c0_20, %c64], %18 {strides = array<i32>} : memref<2x14x96xf32, #tpu.memory_space<vmem>>, vector<1x14x32xf32>,
    %c0_21 = arith.constant 0 : index
    %c0_22 = arith.constant 0 : index
    %c0_23 = arith.constant 0 : index
    %19 = vector.load %arg7[%c0_21, %c0_22, %c0_23] : memref<2x14x96xf32, #tpu.memory_space<vmem>>, vector<1x14x96xf32>
    %20 = vector.shape_cast %19 : vector<1x14x96xf32> to vector<14x96xf32>
    %cst = arith.constant dense<0.000000e+00> : vector<14x32xf32>
    %21 = tpu.matmul %20, %0, %cst {dimension_numbers = #tpu.dot_dimension_numbers<[1], [0], [0], [1], [0, 0, 1, 1], [], []>} : vector<14x96xf32>, vector<96x32xf32>, vector<14x32xf32> -> vector<14x32xf32>
    %22 = vector.broadcast %2 : vector<1x32xf32> to vector<14x32xf32>
    %23 = arith.addf %21, %22 : vector<14x32xf32>
    %cst_24 = arith.constant 0.000000e+00 : f32
    %24 = vector.broadcast %cst_24 : f32 to vector<14x32xf32>
    %25 = arith.maximumf %23, %24 : vector<14x32xf32>
    %cst_25 = arith.constant dense<0.000000e+00> : vector<14x32xf32>
    %26 = tpu.matmul %25, %1, %cst_25 {dimension_numbers = #tpu.dot_dimension_numbers<[1], [0], [0], [1], [0, 0, 1, 1], [], []>} : vector<14x32xf32>, vector<32x32xf32>, vector<14x32xf32> -> vector<14x32xf32>
    %27 = vector.broadcast %3 : vector<1x32xf32> to vector<14x32xf32>
    %28 = arith.addf %26, %27 : vector<14x32xf32>
    %29 = arith.negf %28 : vector<14x32xf32>
    %30 = math.exp %29 : vector<14x32xf32>
    %cst_26 = arith.constant 1.000000e+00 : f32
    %31 = vector.broadcast %cst_26 : f32 to vector<14x32xf32>
    %32 = arith.addf %31, %30 : vector<14x32xf32>
    %33 = arith.divf %31, %32 : vector<14x32xf32>
    %c0_27 = arith.constant 0 : index
    %c0_28 = arith.constant 0 : index
    %c0_29 = arith.constant 0 : index
    %34 = vector.load %arg6[%c0_27, %c0_28, %c0_29] : memref<2x14x32xf32, #tpu.memory_space<vmem>>, vector<1x14x32xf32>
    %35 = vector.shape_cast %34 : vector<1x14x32xf32> to vector<14x32xf32>
    %36 = vector.shape_cast %33 : vector<14x32xf32> to vector<1x14x32xf32>
    tpu.vector_store %arg6[%c0_27, %c0_28, %c0_29], %36 {strides = array<i32>} : memref<2x14x32xf32, #tpu.memory_space<vmem>>, vector<1x14x32xf32>,
    %c1_30 = arith.constant 1 : index
    %c0_31 = arith.constant 0 : index
    %c0_32 = arith.constant 0 : index
    %37 = vector.load %arg1[%c1_30, %c0_31, %c0_32] : memref<2x16x32xf32, #tpu.memory_space<vmem>>, vector<1x14x32xf32>
    %38 = vector.shape_cast %37 : vector<1x14x32xf32> to vector<14x32xf32>
    %c1_33 = arith.constant 1 : index
    %c0_34 = arith.constant 0 : index
    %c0_35 = arith.constant 0 : index
    %39 = vector.load %arg7[%c1_33, %c0_34, %c0_35] : memref<2x14x96xf32, #tpu.memory_space<vmem>>, vector<1x14x32xf32>
    %40 = vector.shape_cast %39 : vector<1x14x32xf32> to vector<14x32xf32>
    %41 = vector.shape_cast %38 : vector<14x32xf32> to vector<1x14x32xf32>
    tpu.vector_store %arg7[%c1_33, %c0_34, %c0_35], %41 {strides = array<i32>} : memref<2x14x96xf32, #tpu.memory_space<vmem>>, vector<1x14x32xf32>,
    %c1_36 = arith.constant 1 : index
    %c1_37 = arith.constant 1 : index
    %c0_38 = arith.constant 0 : index
    %42 = vector.load %arg1[%c1_36, %c1_37, %c0_38] : memref<2x16x32xf32, #tpu.memory_space<vmem>>, vector<1x14x32xf32>
    %43 = vector.shape_cast %42 : vector<1x14x32xf32> to vector<14x32xf32>
    %c1_39 = arith.constant 1 : index
    %c0_40 = arith.constant 0 : index
    %c32_41 = arith.constant 32 : index
    %44 = vector.load %arg7[%c1_39, %c0_40, %c32_41] : memref<2x14x96xf32, #tpu.memory_space<vmem>>, vector<1x14x32xf32>
    %45 = vector.shape_cast %44 : vector<1x14x32xf32> to vector<14x32xf32>
    %46 = vector.shape_cast %43 : vector<14x32xf32> to vector<1x14x32xf32>
    tpu.vector_store %arg7[%c1_39, %c0_40, %c32_41], %46 {strides = array<i32>} : memref<2x14x96xf32, #tpu.memory_space<vmem>>, vector<1x14x32xf32>,
    %c1_42 = arith.constant 1 : index
    %c2_43 = arith.constant 2 : index
    %c0_44 = arith.constant 0 : index
    %47 = vector.load %arg1[%c1_42, %c2_43, %c0_44] : memref<2x16x32xf32, #tpu.memory_space<vmem>>, vector<1x14x32xf32>
    %48 = vector.shape_cast %47 : vector<1x14x32xf32> to vector<14x32xf32>
    %c1_45 = arith.constant 1 : index
    %c0_46 = arith.constant 0 : index
    %c64_47 = arith.constant 64 : index
    %49 = vector.load %arg7[%c1_45, %c0_46, %c64_47] : memref<2x14x96xf32, #tpu.memory_space<vmem>>, vector<1x14x32xf32>
    %50 = vector.shape_cast %49 : vector<1x14x32xf32> to vector<14x32xf32>
    %51 = vector.shape_cast %48 : vector<14x32xf32> to vector<1x14x32xf32>
    tpu.vector_store %arg7[%c1_45, %c0_46, %c64_47], %51 {strides = array<i32>} : memref<2x14x96xf32, #tpu.memory_space<vmem>>, vector<1x14x32xf32>,
    %c1_48 = arith.constant 1 : index
    %c0_49 = arith.constant 0 : index
    %c0_50 = arith.constant 0 : index
    %52 = vector.load %arg7[%c1_48, %c0_49, %c0_50] : memref<2x14x96xf32, #tpu.memory_space<vmem>>, vector<1x14x96xf32>
    %53 = vector.shape_cast %52 : vector<1x14x96xf32> to vector<14x96xf32>
    %cst_51 = arith.constant dense<0.000000e+00> : vector<14x32xf32>
    %54 = tpu.matmul %53, %0, %cst_51 {dimension_numbers = #tpu.dot_dimension_numbers<[1], [0], [0], [1], [0, 0, 1, 1], [], []>} : vector<14x96xf32>, vector<96x32xf32>, vector<14x32xf32> -> vector<14x32xf32>
    %55 = vector.broadcast %2 : vector<1x32xf32> to vector<14x32xf32>
    %56 = arith.addf %54, %55 : vector<14x32xf32>
    %cst_52 = arith.constant 0.000000e+00 : f32
    %57 = vector.broadcast %cst_52 : f32 to vector<14x32xf32>
    %58 = arith.maximumf %56, %57 : vector<14x32xf32>
    %cst_53 = arith.constant dense<0.000000e+00> : vector<14x32xf32>
    %59 = tpu.matmul %58, %1, %cst_53 {dimension_numbers = #tpu.dot_dimension_numbers<[1], [0], [0], [1], [0, 0, 1, 1], [], []>} : vector<14x32xf32>, vector<32x32xf32>, vector<14x32xf32> -> vector<14x32xf32>
    %60 = vector.broadcast %3 : vector<1x32xf32> to vector<14x32xf32>
    %61 = arith.addf %59, %60 : vector<14x32xf32>
    %62 = arith.negf %61 : vector<14x32xf32>
    %63 = math.exp %62 : vector<14x32xf32>
    %cst_54 = arith.constant 1.000000e+00 : f32
    %64 = vector.broadcast %cst_54 : f32 to vector<14x32xf32>
    %65 = arith.addf %64, %63 : vector<14x32xf32>
    %66 = arith.divf %64, %65 : vector<14x32xf32>
    %c1_55 = arith.constant 1 : index
    %c0_56 = arith.constant 0 : index
    %c0_57 = arith.constant 0 : index
    %67 = vector.load %arg6[%c1_55, %c0_56, %c0_57] : memref<2x14x32xf32, #tpu.memory_space<vmem>>, vector<1x14x32xf32>
    %68 = vector.shape_cast %67 : vector<1x14x32xf32> to vector<14x32xf32>
    %69 = vector.shape_cast %66 : vector<14x32xf32> to vector<1x14x32xf32>
    tpu.vector_store %arg6[%c1_55, %c0_56, %c0_57], %69 {strides = array<i32>} : memref<2x14x32xf32, #tpu.memory_space<vmem>>, vector<1x14x32xf32>,
    return
  }
  func.func @transform_0(%arg0: i32) -> (i32, i32, i32) {
    %c0_i32 = arith.constant 0 : i32
    %c0_i32_0 = arith.constant 0 : i32
    %c0_i32_1 = arith.constant 0 : i32
    return %arg0, %c0_i32, %c0_i32_0 : i32, i32, i32
  }
  func.func @transform_1(%arg0: i32) -> (i32, i32) {
    %c0_i32 = arith.constant 0 : i32
    %c0_i32_0 = arith.constant 0 : i32
    %c0_i32_1 = arith.constant 0 : i32
    return %c0_i32, %c0_i32_0 : i32, i32
  }
  func.func @transform_2(%arg0: i32) -> (i32, i32) {
    %c0_i32 = arith.constant 0 : i32
    %c0_i32_0 = arith.constant 0 : i32
    %c0_i32_1 = arith.constant 0 : i32
    return %c0_i32, %c0_i32_0 : i32, i32
  }
  func.func @transform_3(%arg0: i32) -> (i32, i32) {
    %c0_i32 = arith.constant 0 : i32
    %c0_i32_0 = arith.constant 0 : i32
    %c0_i32_1 = arith.constant 0 : i32
    return %c0_i32, %c0_i32_0 : i32, i32
  }
  func.func @transform_4(%arg0: i32) -> (i32, i32) {
    %c0_i32 = arith.constant 0 : i32
    %c0_i32_0 = arith.constant 0 : i32
    %c0_i32_1 = arith.constant 0 : i32
    return %c0_i32, %c0_i32_0 : i32, i32
  }
  func.func @transform_5(%arg0: i32) -> (i32, i32, i32) {
    %c0_i32 = arith.constant 0 : i32
    %c0_i32_0 = arith.constant 0 : i32
    %c0_i32_1 = arith.constant 0 : i32
    return %arg0, %c0_i32, %c0_i32_0 : i32, i32, i32
  }
}

</mosaic_0001>

<bundles_post_ra>
// kernel: tpu_custom_call.1
= control target key start
LH: loop header
LB: loop body
LE: loop exit
PB: predicated region body
PF: predicated region fallthrough
CT: control target
= control target key end

     0   :  { %s358_s22 = smov 32   ;;  %s359_s14 = smov 64   ;;  %vm40_vm0 = vcmask 261120   ;;  %vm42_vm1 = vcmask 259072   ;;  %vm54_vm2 = vcmask 523520   ;;  %vm68_vm3 = vcmask 785920   ;;  %s512_s0 = inlined_call_operand.vmem [shape: f32[2,16,32], index: 0, kind: input, shape index: {}]   ;;  %s513_s1 = inlined_call_operand.vmem [shape: f32[96,32], index: 1, kind: input, shape index: {}]   ;;  %s514_s2 = inlined_call_operand.vmem [shape: f32[1,32], index: 2, kind: input, shape index: {}]   ;;  %s515_s3 = inlined_call_operand.vmem [shape: f32[32,32], index: 3, kind: input, shape index: {}]   ;;  %s516_s4 = inlined_call_operand.vmem [shape: f32[1,32], index: 4, kind: input, shape index: {}]   ;;  %s517_s5 = inlined_call_operand.vmem [shape: f32[2,14,32], index: 5, kind: output, shape index: {}]  }
   0x1   :  { %v326_v0 = vld [vmem:[%s512_s0 + $0x11] sm:$0xff]  ;;  %v327_v1 = vld [vmem:[%s512_s0 + $0x19] sm:$0x3f]  ;;  %v44_v2 = vld [vmem:[%s512_s0 + $0x1] sm:$0xff]  ;;  %vm77_vm4 = vcmask 785408   ;;  %vm56_vm5 = vcmask 521472  }
   0x2   :  { %191 = vrot.lane.b32.xlu0 %v326_v0, %s358_s22  ;;  %193 = vrot.lane.b32.xlu1 %v327_v1, %s358_s22  ;;  %v31_v3 = vld [vmem:[%s513_s1 + $0x58] sm:$0xff]  ;;  %v30_v4 = vld [vmem:[%s513_s1 + $0x50] sm:$0xff]  ;;  %vm70_vm6 = vcmask 783872  }
   0x3   :  { %48 = vrot.lane.b32.xlu2 %v44_v2, %s358_s22  ;;  %88 = vmatpush.msra.mxu0 %v31_v3  ;;  %v29_v5 = vld [vmem:[%s513_s1 + $0x48] sm:$0xff]  ;;  %v328_v6 = vld [vmem:[%s512_s0 + $0x12] sm:$0xff]  ;;  %v329_v7 = vld [vmem:[%s512_s0 + $0x1a] sm:$0x3f] }
   0x4   :  { %223 = vmatpush.msra.mxu2 %v31_v3  ;;  %v28_v8 = vld [vmem:[%s513_s1 + $0x40] sm:$0xff]  ;;  %v45_v10 = vld [vmem:[%s512_s0 + $0x9] sm:$0x3f]  ;;  %v324_v13 = vld [vmem:[%s512_s0 + $0x10] sm:$0xff] }
   0x5   :  { %89 = vmatpush.msra.mxu0 %v30_v4  ;;  %v58_v9 = vld [vmem:[%s512_s0 + $0x2] sm:$0xff]  ;;  %v59_v11 = vld [vmem:[%s512_s0 + $0xa] sm:$0x3f]  ;;  %185 = vst.msk [vmem:[#allocation2 + $0x10] sm:$0xff] %vm40_vm0, %v324_v13  ;;  %v27_v14 = vld [vmem:[%s513_s1 + $0x38] sm:$0xff] }
   0x6   :  { %224 = vmatpush.msra.mxu2 %v30_v4  ;;  %v38_v12 = vld [vmem:[%s512_s0] sm:$0xff]  ;;  %v325_v15 = vld [vmem:[%s512_s0 + $0x18] sm:$0x3f]  ;;  %v26_v16 = vld [vmem:[%s513_s1 + $0x30] sm:$0xff] }
   0x7   :  { %90 = vmatpush.msra.mxu0 %v29_v5  ;;  %41 = vst.msk [vmem:[#allocation2] sm:$0xff] %vm40_vm0, %v38_v12  ;;  %v25_v17 = vld [vmem:[%s513_s1 + $0x28] sm:$0xff]  ;;  %v24_v18 = vld [vmem:[%s513_s1 + $0x20] sm:$0xff]  ;;  %v23_v19 = vld [vmem:[%s513_s1 + $0x18] sm:$0xff] }
   0x8   :  { %225 = vmatpush.msra.mxu2 %v29_v5  ;;  %186 = vst.msk [vmem:[#allocation2 + $0x18] sm:$0x3f] %vm42_vm1, %v325_v15  ;;  %v22_v21 = vld [vmem:[%s513_s1 + $0x10] sm:$0xff]  ;;  %v21_v22 = vld [vmem:[%s513_s1 + $0x8] sm:$0xff]  ;;  %v20_v23 = vld [vmem:[%s513_s1] sm:$0xff] }
   0x9   :  { %91 = vmatpush.msra.mxu0 %v28_v8  ;;  %v39_v24 = vld [vmem:[%s512_s0 + $0x8] sm:$0x3f]  ;;  %v35_v27 = vld [vmem:[%s515_s3 + $0x18] sm:$0xff]  ;;  %v34_v37 = vld [vmem:[%s515_s3 + $0x10] sm:$0xff] }
   0xa   :  { %203 = vrot.lane.b32.xlu0 %v328_v6, %s359_s14  ;;  %205 = vrot.lane.b32.xlu1 %v329_v7, %s359_s14  ;;  %43 = vst.msk [vmem:[#allocation2 + $0x8] sm:$0x3f] %vm42_vm1, %v39_v24  ;;  %v33_v38 = vld [vmem:[%s515_s3 + $0x8] sm:$0xff]  ;;  %v32_v39 = vld [vmem:[%s515_s3] sm:$0xff] }
   0xb   :  { %226 = vmatpush.msra.mxu2 %v28_v8  ;;  %62 = vrot.lane.b32.xlu2 %v58_v9, %s359_s14  ;;  %v340_v40 = vld [vmem:[%s514_s2] ss:$0 sm:$0xff] }
   0xc   :  { %92 = vmatpush.msra.mxu0 %v27_v14  ;;  %130 = vmatpush.msra.mxu1 %v35_v27  ;;  %v341_v53 = vld [vmem:[%s516_s4] ss:$0 sm:$0xff] }
   0xd   :  { %227 = vmatpush.msra.mxu2 %v27_v14  ;;  %262 = vmatpush.msra.mxu3 %v35_v27 }
   0xe   :  { %93 = vmatpush.msra.mxu0 %v26_v16  ;;  %131 = vmatpush.msra.mxu1 %v34_v37 }
   0xf   :  { %228 = vmatpush.msra.mxu2 %v26_v16  ;;  %263 = vmatpush.msra.mxu3 %v34_v37 }
  0x10   :  { %94 = vmatpush.msra.mxu0 %v25_v17  ;;  %132 = vmatpush.msra.mxu1 %v33_v38 }
  0x11   :  { %229 = vmatpush.msra.mxu2 %v25_v17  ;;  %264 = vmatpush.msra.mxu3 %v33_v38 }
  0x12   :  { %50 = vrot.lane.b32.xlu0 %v45_v10, %s358_s22  ;;  %64 = vrot.lane.b32.xlu1 %v59_v11, %s359_s14 }
  0x13   :  { %95 = vmatpush.msra.mxu0 %v24_v18  ;;  %230 = vmatpush.msra.mxu2 %v24_v18 }
  0x14   :  { %133 = vmatpush.msra.mxu1 %v32_v39  ;;  %265 = vmatpush.msra.mxu3 %v32_v39 }
  0x15   :  { %96 = vmatpush.msra.mxu0 %v23_v19  ;;  %231 = vmatpush.msra.mxu2 %v23_v19 }
  0x17   :  { %97 = vmatpush.msra.mxu0 %v22_v21  ;;  %232 = vmatpush.msra.mxu2 %v22_v21 }
  0x19   :  { %98 = vmatpush.msra.mxu0 %v21_v22  ;;  %233 = vmatpush.msra.mxu2 %v21_v22 }
  0x1b   :  { %99 = vmatpush.msra.mxu0 %v20_v23  ;;  %234 = vmatpush.msra.mxu2 %v20_v23 }
  0x5d   :  { %v49_v20 = vpop.permute.xlu2 %48 }
  0x5e   :  { %55 = vst.msk [vmem:[#allocation2] sm:$0xff] %vm54_vm2, %v49_v20 }
  0x65   :  { %v63_v25 = vpop.permute.xlu2 %62 }
  0x66   :  { %69 = vst.msk [vmem:[#allocation2] sm:$0xff] %vm68_vm3, %v63_v25 }
  0x6d   :  { %v72_v26 = vld [vmem:[#allocation2] sm:$0xff] }
  0x6e   :  { %318 = vmatmul.msk.f32.vlgmr.msra.gmra.mxu0 %vm77_vm4, %v72_v26 }
  0x74   :  { %v192_v28 = vpop.permute.xlu0 %191  ;;  %v194_v29 = vpop.permute.xlu1 %193 }
  0x75   :  { %197 = vst.msk [vmem:[#allocation2 + $0x10] sm:$0xff] %vm54_vm2, %v192_v28 }
  0x76   :  { %198 = vst.msk [vmem:[#allocation2 + $0x18] sm:$0x3f] %vm56_vm5, %v194_v29 }
  0x7c   :  { %v204_v30 = vpop.permute.xlu0 %203  ;;  %v206_v31 = vpop.permute.xlu1 %205 }
  0x7d   :  { %209 = vst.msk [vmem:[#allocation2 + $0x10] sm:$0xff] %vm68_vm3, %v204_v30 }
  0x7e   :  { %210 = vst.msk [vmem:[#allocation2 + $0x18] sm:$0x3f] %vm70_vm6, %v206_v31 }
  0x84   :  { %v51_v32 = vpop.permute.xlu0 %50  ;;  %v211_v33 = vld [vmem:[#allocation2 + $0x10] sm:$0xff]  ;;  %v65_v34 = vpop.permute.xlu1 %64 }
  0x85   :  { %57 = vst.msk [vmem:[#allocation2 + $0x8] sm:$0x3f] %vm56_vm5, %v51_v32  ;;  %330 = vmatmul.msk.f32.vlgmr.msra.gmra.mxu2 %vm77_vm4, %v211_v33  ;;  %v212_v35 = vld [vmem:[#allocation2 + $0x18] sm:$0x3f] }
  0x86   :  { %71 = vst.msk [vmem:[#allocation2 + $0x8] sm:$0x3f] %vm70_vm6, %v65_v34 }
  0x8d   :  { %331 = vmatmul.msk.f32.gmra.mxu2 %vm77_vm4, %v212_v35  ;;  %v73_v36 = vld [vmem:[#allocation2 + $0x8] sm:$0x3f] }
  0x8e   :  { %319 = vmatmul.msk.f32.gmra.mxu0 %vm77_vm4, %v73_v36 }
  0xeb   :  { %v101_v41 = vpop.f32.mrf.mxu0 }
  0xec   :  { %v102_v42 = vadd.f32 %v340_v40, %v101_v41 }
  0xee   :  { %v107_v43 = vmax.f32 %v102_v42, 0.0 }
  0xf0   :  { %320 = vmatmul.msk.f32.vlgmr.msra.gmra.mxu1 %vm40_vm0, %v107_v43 }
 0x108   :  { %v236_v44 = vpop.f32.mrf.mxu2 }
 0x109   :  { %v237_v45 = vadd.f32 %v340_v40, %v236_v44 }
 0x10b   :  { %v242_v46 = vmax.f32 %v237_v45, 0.0  ;;  %v104_v47 = vpop.f32.mrf.mxu0 }
 0x10c   :  { %v105_v48 = vadd.f32 %v340_v40, %v104_v47 }
 0x10d   :  { %332 = vmatmul.msk.f32.vlgmr.msra.gmra.mxu3 %vm40_vm0, %v242_v46 }
 0x10e   :  { %v108_v49 = vmax.f32 %v105_v48, 0.0 }
 0x110   :  { %321 = vmatmul.msk.f32.gmra.mxu1 %vm40_vm0, %v108_v49  ;;  %v239_v50 = vpop.f32.mrf.mxu2 }
 0x111   :  { %v240_v51 = vadd.f32 %v340_v40, %v239_v50 }
 0x113   :  { %v243_v52 = vmax.f32 %v240_v51, 0.0 }
 0x115   :  { %333 = vmatmul.msk.f32.gmra.mxu3 %vm40_vm0, %v243_v52 }
 0x16d   :  { %v135_v54 = vpop.f32.mrf.mxu1 }
 0x16e   :  { %v136_v55 = vadd.f32 %v341_v53, %v135_v54 }
 0x170   :  { %v322_v56 = vmul.f32 -1.442695, %v136_v55 }
 0x172   :  { %342 = vpow2.f32 %v322_v56 }
 0x178   :  { %v343_v57 = vpop.eup %342 }
 0x179   :  { %v147_v58 = vadd.f32 1.0, %v343_v57 }
 0x17b   :  { %344 = vrcp.f32 %v147_v58  ;;  %v160_v61 = vand.u32 2147483648, %v147_v58  ;;  %vm154_vm7 = vweird.f32 %v147_v58  ;;  %v158_v63 = vand.u32 2147483647, %v147_v58 }
 0x17d   :  { %v161_v1 = vor.u32 1.1754944e-38, %v160_v61  ;;  %vm159_vm10 = vcmp.eq.f32.partialorder %v158_v63, 8.507059e+37 }
 0x181   :  { %v345_v59 = vpop.eup %344 }
 0x182   :  { %v150_v60 = vmul.f32 %v345_v59, %v147_v58  ;;  %vm155_vm8 = vweird.f32 %v345_v59 }
 0x183   :  { %vm156_vm9 = vmor %vm154_vm7, %vm155_vm8 }
 0x184   :  { %v151_v62 = vsub.f32 1.0, %v150_v60 }
 0x186   :  { %v152_v0 = vmul.f32 %v345_v59, %v151_v62 }
 0x188   :  { %v153_v2 = vadd.f32 %v345_v59, %v152_v0 }
 0x18a   :  { %v157_v3 = vsel %vm156_vm9, %v345_v59, %v153_v2 }
 0x18b   :  { %v162_v4 = vsel %vm159_vm10, %v161_v1, %v157_v3 }
 0x18c   :  { %179 = vst.msk [vmem:[%s517_s5] sm:$0xff] %vm40_vm0, %v162_v4 }
 0x18d   :  { %v138_v5 = vpop.f32.mrf.mxu1 }
 0x18e   :  { %v139_v6 = vadd.f32 %v341_v53, %v138_v5 }
 0x190   :  { %v323_v7 = vmul.f32 -1.442695, %v139_v6  ;;  %v267_v8 = vpop.f32.mrf.mxu3 }
 0x191   :  { %v268_v9 = vadd.f32 %v341_v53, %v267_v8 }
 0x192   :  { %346 = vpow2.f32 %v323_v7 }
 0x193   :  { %v334_v10 = vmul.f32 -1.442695, %v268_v9 }
 0x195   :  { %348 = vpow2.f32 %v334_v10 }
 0x198   :  { %v347_v11 = vpop.eup %346  ;;  %v270_v12 = vpop.f32.mrf.mxu3 }
 0x199   :  { %v148_v13 = vadd.f32 1.0, %v347_v11  ;;  %v271_v14 = vadd.f32 %v341_v53, %v270_v12 }
 0x19b   :  { %v349_v15 = vpop.eup %348  ;;  %350 = vrcp.f32 %v148_v13  ;;  %v335_v17 = vmul.f32 -1.442695, %v271_v14  ;;  %v175_v20 = vand.u32 2147483648, %v148_v13  ;;  %vm169_vm11 = vweird.f32 %v148_v13 }
 0x19c   :  { %v279_v16 = vadd.f32 1.0, %v349_v15  ;;  %v173_v26 = vand.u32 2147483647, %v148_v13 }
 0x19d   :  { %v176_v28 = vor.u32 1.1754944e-38, %v175_v20 }
 0x19e   :  { %352 = vrcp.f32 %v279_v16  ;;  %v292_v31 = vand.u32 2147483648, %v279_v16  ;;  %v290_v33 = vand.u32 2147483647, %v279_v16  ;;  %vm174_vm15 = vcmp.eq.f32.partialorder %v173_v26, 8.507059e+37 }
 0x19f   :  { %354 = vpow2.f32 %v335_v17  ;;  %vm286_vm2 = vweird.f32 %v279_v16 }
 0x1a0   :  { %v293_v37 = vor.u32 1.1754944e-38, %v292_v31  ;;  %vm291_vm4 = vcmp.eq.f32.partialorder %v290_v33, 8.507059e+37 }
 0x1a1   :  { %v351_v18 = vpop.eup %350 }
 0x1a2   :  { %v165_v19 = vmul.f32 %v351_v18, %v148_v13  ;;  %vm170_vm12 = vweird.f32 %v351_v18 }
 0x1a3   :  { %vm171_vm13 = vmor %vm169_vm11, %vm170_vm12 }
 0x1a4   :  { %v353_v21 = vpop.eup %352  ;;  %v166_v22 = vsub.f32 1.0, %v165_v19 }
 0x1a5   :  { %v355_v23 = vpop.eup %354  ;;  %v282_v24 = vmul.f32 %v353_v21, %v279_v16  ;;  %vm287_vm14 = vweird.f32 %v353_v21 }
 0x1a6   :  { %v167_v25 = vmul.f32 %v351_v18, %v166_v22  ;;  %v280_v27 = vadd.f32 1.0, %v355_v23  ;;  %vm288_vm3 = vmor %vm286_vm2, %vm287_vm14 }
 0x1a7   :  { %v283_v29 = vsub.f32 1.0, %v282_v24 }
 0x1a8   :  { %v168_v30 = vadd.f32 %v351_v18, %v167_v25  ;;  %356 = vrcp.f32 %v280_v27  ;;  %v307_v43 = vand.u32 2147483648, %v280_v27  ;;  %v305_v45 = vand.u32 2147483647, %v280_v27 }
 0x1a9   :  { %v284_v32 = vmul.f32 %v353_v21, %v283_v29  ;;  %vm301_vm6 = vweird.f32 %v280_v27 }
 0x1aa   :  { %v172_v34 = vsel %vm171_vm13, %v351_v18, %v168_v30  ;;  %v308_v47 = vor.u32 1.1754944e-38, %v307_v43  ;;  %vm306_vm8 = vcmp.eq.f32.partialorder %v305_v45, 8.507059e+37 }
 0x1ab   :  { %v177_v35 = vsel %vm174_vm15, %v176_v28, %v172_v34  ;;  %v285_v36 = vadd.f32 %v353_v21, %v284_v32 }
 0x1ac   :  { %180 = vst.msk [vmem:[%s517_s5 + $0x8] sm:$0x3f] %vm42_vm1, %v177_v35 }
 0x1ad   :  { %v289_v38 = vsel %vm288_vm3, %v353_v21, %v285_v36 }
 0x1ae   :  { %v357_v39 = vpop.eup %356  ;;  %v294_v40 = vsel %vm291_vm4, %v293_v37, %v289_v38 }
 0x1af   :  { %336 = vst.msk [vmem:[%s517_s5 + $0x10] sm:$0xff] %vm40_vm0, %v294_v40  ;;  %v297_v41 = vmul.f32 %v357_v39, %v280_v27  ;;  %vm302_vm5 = vweird.f32 %v357_v39 }
 0x1b0   :  { %vm303_vm7 = vmor %vm301_vm6, %vm302_vm5 }
 0x1b1   :  { %v298_v42 = vsub.f32 1.0, %v297_v41 }
 0x1b3   :  { %v299_v44 = vmul.f32 %v357_v39, %v298_v42 }
 0x1b5   :  { %v300_v46 = vadd.f32 %v357_v39, %v299_v44 }
 0x1b7   :  { %v304_v48 = vsel %vm303_vm7, %v357_v39, %v300_v46 }
 0x1b8   :  { %v309_v49 = vsel %vm306_vm8, %v308_v47, %v304_v48 }
 0x1b9   :  { %337 = vst.msk [vmem:[%s517_s5 + $0x18] sm:$0x3f] %vm42_vm1, %v309_v49 }

</bundles_post_ra>
